<compile_context>
chip_gen: v5e
topology: v5e:2x2
jax: 0.10.0
libtpu: 0.0.40
codegen_flags: <defaults>
</compile_context>

<pallas_src>
import jax
import jax.numpy as jnp
from jax.experimental import pallas as pl
from jax.experimental.pallas import tpu as pltpu

LANE = 128
SUBLANE = 8


def _round_up(n, m):
    return ((n + m - 1) // m) * m


def _vmem_capacity_bytes():
    """Physical VMEM per TensorCore; conservative (v7x) fallback if unknown."""
    try:
        return int(pltpu.get_tpu_info().vmem_capacity_bytes)
    except Exception:
        return 64 * 1024 * 1024


def _pinned_spec(shape, single_buffer=True):
    """Whole-weight block pinned to block (0, 0) on every grid step."""
    pinned = lambda i: (0, 0)
    if single_buffer:
        try:
            # Block index never changes -> one VMEM copy is enough.
            return pl.BlockSpec(shape, pinned, pipeline_mode=pl.Buffered(1))
        except Exception:  # older jax without pipeline_mode / Buffered
            pass
    return pl.BlockSpec(shape, pinned)


def dueling_dqn_kernel(x_ref, w1_ref, b1_ref, w2_ref, b2_ref, wq_ref, bq_ref,
                       q_ref):
    """Fused fc1+ReLU -> fc2+ReLU -> folded (value/advantage/dueling) head."""
    w_dtype = w1_ref.dtype              # f32, or bf16 on the fast-weight path
    x = x_ref[...].astype(w_dtype)

    # base_network.fc1 + ReLU  (bias add / ReLU in f32: v5e VPU has no bf16)
    h1 = jnp.dot(x, w1_ref[...], preferred_element_type=jnp.float32)
    h1 = jnp.maximum(h1 + b1_ref[...], 0.0)

    # base_network.fc2 + ReLU  (fc3 is Identity -> nothing to do)
    h2 = jnp.dot(h1.astype(w_dtype), w2_ref[...],
                 preferred_element_type=jnp.float32)
    h2 = jnp.maximum(h2 + b2_ref[...], 0.0)

    # folded dueling head:  q = V + A - mean(A)  ==  h2 @ Wq + bq   (exact)
    q = jnp.dot(h2.astype(w_dtype), wq_ref[...],
                preferred_element_type=jnp.float32)
    q_ref[...] = (q + bq_ref[...]).astype(q_ref.dtype)


def dueling_dqn_forward(x, params, *, tile_m=None, use_bf16_weights=True):
    """Fold the dueling heads, lane-align all feature dims, tile the batch."""
    w1, b1, w2, b2, wv, bv, wa, ba = params
    batch, in_dim = x.shape
    hidden_dim = w1.shape[1]
    n_actions = wa.shape[1]

    # --- exact algebraic fold of value/advantage heads + dueling combine.
    wq = wv + wa - jnp.mean(wa, axis=1, keepdims=True)
    bq = bv + ba - jnp.mean(ba, axis=1, keepdims=True)

    w_dtype = jnp.bfloat16 if use_bf16_weights else jnp.float32
    w_bytes = jnp.dtype(w_dtype).itemsize

    # --- lane-align every feature dim (K and N of all matmuls, incl. Q out).
    in_p = _round_up(in_dim, LANE)
    hid_p = _round_up(hidden_dim, LANE)
    act_p = _round_up(n_actions, LANE)

    def pad2(a, rows, cols, dtype):
        a = jnp.asarray(a, dtype)
        return jnp.pad(a, ((0, rows - a.shape[0]), (0, cols - a.shape[1])))

    w1c = pad2(w1, in_p, hid_p, w_dtype)
    b1c = pad2(b1, 1, hid_p, jnp.float32)
    w2c = pad2(w2, hid_p, hid_p, w_dtype)
    b2c = pad2(b2, 1, hid_p, jnp.float32)
    wqc = pad2(wq, hid_p, act_p, w_dtype)
    bqc = pad2(bq, 1, act_p, jnp.float32)

    xp = x.astype(jnp.float32)
    if in_p != in_dim:
        xp = jnp.pad(xp, ((0, 0), (0, in_p - in_dim)))

    # --- VMEM budget: resident (single-buffered) weights + per-row tile cost.
    weight_bytes = (in_p * hid_p + hid_p * hid_p + hid_p * act_p) * w_bytes
    weight_bytes += (2 * hid_p + act_p) * 4 * 2                # biases (2-buf)
    per_row_bytes = (2 * (in_p + act_p) * 4                    # x/q tiles, 2-buf
                     + 2 * hid_p * 4                           # h1/h2 f32 temps
                     + (in_p + 2 * hid_p) * w_bytes)           # MXU-dtype copies
    vmem_budget = int(0.75 * _vmem_capacity_bytes())

    if tile_m is None:
        avail = vmem_budget - weight_bytes - (4 << 20)
        tile_m = max(SUBLANE, min(2048, avail // max(per_row_bytes, 1)))
    tile_m = max(SUBLANE, (int(tile_m) // SUBLANE) * SUBLANE)
    # never pad a small batch all the way up to a full tile
    tile_m = min(tile_m, _round_up(batch, SUBLANE))

    padded_batch = _round_up(batch, tile_m)
    if padded_batch != batch:
        xp = jnp.pad(xp, ((0, padded_batch - batch), (0, 0)))
    grid = (padded_batch // tile_m,)

    vmem_limit = weight_bytes + tile_m * per_row_bytes + (8 << 20)
    vmem_limit = int(min(max(vmem_limit, 32 << 20), vmem_budget))

    q_padded = pl.pallas_call(
        dueling_dqn_kernel,
        out_shape=jax.ShapeDtypeStruct((padded_batch, act_p), jnp.float32),
        grid=grid,
        in_specs=[
            pl.BlockSpec((tile_m, in_p), lambda i: (i, 0)),     # x tile
            _pinned_spec((in_p, hid_p)),                        # w1 (1 buffer)
            _pinned_spec((1, hid_p), single_buffer=False),      # b1
            _pinned_spec((hid_p, hid_p)),                       # w2 (1 buffer)
            _pinned_spec((1, hid_p), single_buffer=False),      # b2
            _pinned_spec((hid_p, act_p)),                       # wq (1 buffer)
            _pinned_spec((1, act_p), single_buffer=False),      # bq
        ],
        out_specs=pl.BlockSpec((tile_m, act_p), lambda i: (i, 0)),
        compiler_params=pltpu.CompilerParams(
            dimension_semantics=("parallel",),     # megacore-shardable batch
            vmem_limit_bytes=vmem_limit,
        ),
    )(xp, w1c, b1c, w2c, b2c, wqc, bqc)

    return q_padded[:batch, :n_actions]


def init_params(key, in_dim, hidden_dim, n_actions):
    """Deterministic synthetic parameters (shapes match the PyTorch module)."""
    k1, k2, k3, k4 = jax.random.split(key, 4)

    # base network fc1 / fc2 (synthetic stand-in for the wrapped DQN)
    w1 = jax.random.normal(k1, (in_dim, hidden_dim), jnp.float32) * 0.1
    b1 = jnp.zeros((1, hidden_dim), jnp.float32)
    w2 = jax.random.normal(k2, (hidden_dim, hidden_dim), jnp.float32) * 0.1
    b2 = jnp.zeros((1, hidden_dim), jnp.float32)

    # value_head: Linear(hidden, 1), kaiming_normal fan_out, relu gain
    std_v = (2.0 / 1.0) ** 0.5
    wv = jax.random.normal(k3, (hidden_dim, 1), jnp.float32) * std_v
    bv = jnp.zeros((1, 1), jnp.float32)

    # advantage_head: Linear(hidden, 4), kaiming_normal fan_out, relu gain
    std_a = (2.0 / n_actions) ** 0.5
    wa = jax.random.normal(k4, (hidden_dim, n_actions), jnp.float32) * std_a
    ba = jnp.zeros((1, n_actions), jnp.float32)

    return (w1, b1, w2, b2, wv, bv, wa, ba)


def reference_forward(x, params):
    """Pure-JAX reference of the ORIGINAL (unfolded) forward pass."""
    w1, b1, w2, b2, wv, bv, wa, ba = params
    h1 = jnp.maximum(x @ w1 + b1, 0.0)
    h2 = jnp.maximum(h1 @ w2 + b2, 0.0)
    value = h2 @ wv + bv
    adv = h2 @ wa + ba
    return value + adv - adv.mean(axis=1, keepdims=True)


if __name__ == "__main__":
    batch, in_dim, hidden_dim, n_actions = 8, 16, 32, 4

    key = jax.random.PRNGKey(0)
    k_x, k_p = jax.random.split(key)

    x = jax.random.normal(k_x, (batch, in_dim), jnp.float32)
    params = init_params(k_p, in_dim, hidden_dim, n_actions)
    q_ref = reference_forward(x, params)

    # exact f32-weight path (single tile, batch=8)
    q32 = jax.block_until_ready(
        dueling_dqn_forward(x, params, use_bf16_weights=False))
    assert q32.shape == (batch, n_actions)
    assert jnp.allclose(q32, q_ref, atol=1e-4, rtol=1e-4)

    # default bf16-weight fast path (f32 accumulation) -> looser tolerance
    qbf = jax.block_until_ready(dueling_dqn_forward(x, params))
    assert qbf.shape == (batch, n_actions)
    assert jnp.allclose(qbf, q_ref, atol=5e-2, rtol=5e-2)

    # multi-tile grid + ragged-batch padding path
    xb = jax.random.normal(jax.random.PRNGKey(1), (200, in_dim), jnp.float32)
    qb = jax.block_until_ready(
        dueling_dqn_forward(xb, params, tile_m=64, use_bf16_weights=False))
    assert qb.shape == (200, n_actions)
    assert jnp.allclose(qb, reference_forward(xb, params), atol=1e-4, rtol=1e-4)

    print("KERNEL_OK")
</pallas_src>

<mosaic_0001>
module attributes {stable_mosaic.version = 11 : i64} {
  func.func @dueling_dqn_kernel(%arg0: i32, %arg1: memref<8x128xf32, #tpu.memory_space<vmem>>, %arg2: memref<128x128xf32, #tpu.memory_space<vmem>>, %arg3: memref<1x128xf32, #tpu.memory_space<vmem>>, %arg4: memref<128x128xf32, #tpu.memory_space<vmem>>, %arg5: memref<1x128xf32, #tpu.memory_space<vmem>>, %arg6: memref<128x128xf32, #tpu.memory_space<vmem>>, %arg7: memref<1x128xf32, #tpu.memory_space<vmem>>, %arg8: memref<8x128xf32, #tpu.memory_space<vmem>>) attributes {dimension_semantics = [#tpu.dimension_semantics<parallel>], iteration_bounds = array<i64: 1>, scalar_prefetch = 0 : i64, scratch_operands = 0 : i64, tpu.core_type = #tpu.core_type<tc>, window_params = [{transform_indices = @transform_0, window_bounds = array<i64: 8, 128>}, {pipeline_mode = #tpu.pipeline_mode<synchronous>, transform_indices = @transform_1, window_bounds = array<i64: 128, 128>}, {pipeline_mode = #tpu.pipeline_mode<synchronous>, transform_indices = @transform_2, window_bounds = array<i64: 1, 128>}, {pipeline_mode = #tpu.pipeline_mode<synchronous>, transform_indices = @transform_3, window_bounds = array<i64: 128, 128>}, {pipeline_mode = #tpu.pipeline_mode<synchronous>, transform_indices = @transform_4, window_bounds = array<i64: 1, 128>}, {pipeline_mode = #tpu.pipeline_mode<synchronous>, transform_indices = @transform_5, window_bounds = array<i64: 128, 128>}, {pipeline_mode = #tpu.pipeline_mode<synchronous>, transform_indices = @transform_6, window_bounds = array<i64: 1, 128>}, {transform_indices = @transform_7, window_bounds = array<i64: 8, 128>}]} {
    %c0 = arith.constant 0 : index
    %c0_0 = arith.constant 0 : index
    %0 = vector.load %arg1[%c0, %c0_0] : memref<8x128xf32, #tpu.memory_space<vmem>>, vector<8x128xf32>
    %c0_1 = arith.constant 0 : index
    %c0_2 = arith.constant 0 : index
    %1 = vector.load %arg2[%c0_1, %c0_2] : memref<128x128xf32, #tpu.memory_space<vmem>>, vector<128x128xf32>
    %cst = arith.constant dense<0.000000e+00> : vector<8x128xf32>
    %2 = tpu.matmul %0, %1, %cst {dimension_numbers = #tpu.dot_dimension_numbers<[1], [0], [0], [1], [0, 0, 1, 1], [], []>} : vector<8x128xf32>, vector<128x128xf32>, vector<8x128xf32> -> vector<8x128xf32>
    %c0_3 = arith.constant 0 : index
    %c0_4 = arith.constant 0 : index
    %3 = vector.load %arg3[%c0_3, %c0_4] : memref<1x128xf32, #tpu.memory_space<vmem>>, vector<1x128xf32>
    %4 = vector.broadcast %3 : vector<1x128xf32> to vector<8x128xf32>
    %5 = arith.addf %2, %4 : vector<8x128xf32>
    %cst_5 = arith.constant 0.000000e+00 : f32
    %6 = vector.broadcast %cst_5 : f32 to vector<8x128xf32>
    %7 = arith.maximumf %5, %6 : vector<8x128xf32>
    %c0_6 = arith.constant 0 : index
    %c0_7 = arith.constant 0 : index
    %8 = vector.load %arg4[%c0_6, %c0_7] : memref<128x128xf32, #tpu.memory_space<vmem>>, vector<128x128xf32>
    %cst_8 = arith.constant dense<0.000000e+00> : vector<8x128xf32>
    %9 = tpu.matmul %7, %8, %cst_8 {dimension_numbers = #tpu.dot_dimension_numbers<[1], [0], [0], [1], [0, 0, 1, 1], [], []>} : vector<8x128xf32>, vector<128x128xf32>, vector<8x128xf32> -> vector<8x128xf32>
    %c0_9 = arith.constant 0 : index
    %c0_10 = arith.constant 0 : index
    %10 = vector.load %arg5[%c0_9, %c0_10] : memref<1x128xf32, #tpu.memory_space<vmem>>, vector<1x128xf32>
    %11 = vector.broadcast %10 : vector<1x128xf32> to vector<8x128xf32>
    %12 = arith.addf %9, %11 : vector<8x128xf32>
    %cst_11 = arith.constant 0.000000e+00 : f32
    %13 = vector.broadcast %cst_11 : f32 to vector<8x128xf32>
    %14 = arith.maximumf %12, %13 : vector<8x128xf32>
    %c0_12 = arith.constant 0 : index
    %c0_13 = arith.constant 0 : index
    %15 = vector.load %arg6[%c0_12, %c0_13] : memref<128x128xf32, #tpu.memory_space<vmem>>, vector<128x128xf32>
    %cst_14 = arith.constant dense<0.000000e+00> : vector<8x128xf32>
    %16 = tpu.matmul %14, %15, %cst_14 {dimension_numbers = #tpu.dot_dimension_numbers<[1], [0], [0], [1], [0, 0, 1, 1], [], []>} : vector<8x128xf32>, vector<128x128xf32>, vector<8x128xf32> -> vector<8x128xf32>
    %c0_15 = arith.constant 0 : index
    %c0_16 = arith.constant 0 : index
    %17 = vector.load %arg7[%c0_15, %c0_16] : memref<1x128xf32, #tpu.memory_space<vmem>>, vector<1x128xf32>
    %18 = vector.broadcast %17 : vector<1x128xf32> to vector<8x128xf32>
    %19 = arith.addf %16, %18 : vector<8x128xf32>
    %c0_17 = arith.constant 0 : index
    %c0_18 = arith.constant 0 : index
    %20 = vector.load %arg8[%c0_17, %c0_18] : memref<8x128xf32, #tpu.memory_space<vmem>>, vector<8x128xf32>
    tpu.vector_store %arg8[%c0_17, %c0_18], %19 {strides = array<i32>} : memref<8x128xf32, #tpu.memory_space<vmem>>, vector<8x128xf32>,
    return
  }
  func.func @transform_0(%arg0: i32) -> (i32, i32) {
    %c0_i32 = arith.constant 0 : i32
    %c0_i32_0 = arith.constant 0 : i32
    return %arg0, %c0_i32 : i32, i32
  }
  func.func @transform_1(%arg0: i32) -> (i32, i32) {
    %c0_i32 = arith.constant 0 : i32
    %c0_i32_0 = arith.constant 0 : i32
    %c0_i32_1 = arith.constant 0 : i32
    return %c0_i32, %c0_i32_0 : i32, i32
  }
  func.func @transform_2(%arg0: i32) -> (i32, i32) {
    %c0_i32 = arith.constant 0 : i32
    %c0_i32_0 = arith.constant 0 : i32
    %c0_i32_1 = arith.constant 0 : i32
    return %c0_i32, %c0_i32_0 : i32, i32
  }
  func.func @transform_3(%arg0: i32) -> (i32, i32) {
    %c0_i32 = arith.constant 0 : i32
    %c0_i32_0 = arith.constant 0 : i32
    %c0_i32_1 = arith.constant 0 : i32
    return %c0_i32, %c0_i32_0 : i32, i32
  }
  func.func @transform_4(%arg0: i32) -> (i32, i32) {
    %c0_i32 = arith.constant 0 : i32
    %c0_i32_0 = arith.constant 0 : i32
    %c0_i32_1 = arith.constant 0 : i32
    return %c0_i32, %c0_i32_0 : i32, i32
  }
  func.func @transform_5(%arg0: i32) -> (i32, i32) {
    %c0_i32 = arith.constant 0 : i32
    %c0_i32_0 = arith.constant 0 : i32
    %c0_i32_1 = arith.constant 0 : i32
    return %c0_i32, %c0_i32_0 : i32, i32
  }
  func.func @transform_6(%arg0: i32) -> (i32, i32) {
    %c0_i32 = arith.constant 0 : i32
    %c0_i32_0 = arith.constant 0 : i32
    %c0_i32_1 = arith.constant 0 : i32
    return %c0_i32, %c0_i32_0 : i32, i32
  }
  func.func @transform_7(%arg0: i32) -> (i32, i32) {
    %c0_i32 = arith.constant 0 : i32
    %c0_i32_0 = arith.constant 0 : i32
    return %arg0, %c0_i32 : i32, i32
  }
}

</mosaic_0001>

<bundles_post_ra>
// kernel: tpu_custom_call.1
= control target key start
LH: loop header
LB: loop body
LE: loop exit
PB: predicated region body
PF: predicated region fallthrough
CT: control target
= control target key end

     0   :  { %12 = vsyncpa [#allocation3], 0  ;;  %s440_s0 = inlined_call_operand.hbm [shape: f32[8,128], index: 0, kind: input, shape index: {}]   ;;  %s441_s1 = inlined_call_operand.hbm [shape: f32[128,128], index: 1, kind: input, shape index: {}]   ;;  %s442_s2 = inlined_call_operand.vmem [shape: f32[1,128], index: 2, kind: input, shape index: {}]   ;;  %s443_s3 = inlined_call_operand.hbm [shape: f32[128,128], index: 3, kind: input, shape index: {}]   ;;  %s444_s4 = inlined_call_operand.vmem [shape: f32[1,128], index: 4, kind: input, shape index: {}]   ;;  %s445_s5 = inlined_call_operand.hbm [shape: f32[128,128], index: 5, kind: input, shape index: {}]   ;;  %s446_s6 = inlined_call_operand.vmem [shape: f32[1,128], index: 6, kind: input, shape index: {}]   ;;  %s447_s7 = inlined_call_operand.hbm [shape: f32[8,128], index: 7, kind: output, shape index: {}]  }
   0x1   :  { %13 = vsyncpa [#allocation6], 0 }
   0x2   :  { %14 = vsyncpa [#allocation9], 0  ;;  %s31_s26 = sshll.u32 %s441_s1, 4  ;;  %s32_s26 = int_to_ptr.hbm [resolvable:$true] %s31_s26 }
   0x3   :  { %15 = vsyncpa [#allocation4], 0  ;;  %s369_s27 = smov [#allocation5]   ;;  %s21_s8 = sshll.u32 %s440_s0, 4  ;;  %s22_s8 = int_to_ptr.hbm [resolvable:$true] %s21_s8 }
   0x4   :  { %s33_s28 = sshll.u32 %s369_s27, 4  ;;  %s370_s9 = smov 128   ;;  %s34_s28 = int_to_ptr.vmem [resolvable:$true] %s33_s28 }
   0x5   :  { %s371_s10 = smov 8   ;;  %s372_s11 = smov [#allocation2]  }
   0x6   :  { %39 = dma.hbm_to_vmem [thread:$0]  %s32_s26, 2048, %s34_s28, [#allocation6], %s370_s9, %s370_s9, %s371_s10  }
   0x7   :  { %s23_s12 = sshll.u32 %s372_s11, 4  ;;  %s46_s15 = sshll.u32 %s443_s3, 4  ;;  %s24_s12 = int_to_ptr.vmem [resolvable:$true] %s23_s12  ;;  %s47_s15 = int_to_ptr.hbm [resolvable:$true] %s46_s15 }
   0x8   :  { %26 = dma.hbm_to_vmem [thread:$0]  %s22_s8, 128, %s24_s12, [#allocation3]  }
   0x9   :  { %s61_s17 = sshll.u32 %s445_s5, 4  ;;  %s373_s18 = smov [#allocation7]   ;;  %s62_s17 = int_to_ptr.hbm [resolvable:$true] %s61_s17 }
   0xa   :  { %s48_s19 = sshll.u32 %s373_s18, 4  ;;  %s374_s0 = smov [#allocation8]   ;;  %s49_s19 = int_to_ptr.vmem [resolvable:$true] %s48_s19 }
   0xb   :  { %54 = dma.hbm_to_vmem [thread:$0]  %s47_s15, 2048, %s49_s19, [#allocation6], %s370_s9, %s370_s9, %s371_s10  }
   0xc   :  { %s63_s20 = sshll.u32 %s374_s0, 4  ;;  %s64_s20 = int_to_ptr.vmem [resolvable:$true] %s63_s20 }
   0xd   :  { %69 = dma.hbm_to_vmem [thread:$0]  %s62_s17, 2048, %s64_s20, [#allocation9], %s370_s9, %s370_s9, %s371_s10  }
   0xe   :  { %361 = dma.done.wait [#allocation3], 128  }
   0xf   :  { %362 = vsyncadd [#allocation3], 4294967168 }
  0x10   :  { %363 = dma.done.wait [#allocation6], 4096  }
  0x11   :  { %364 = vsyncadd [#allocation6], 4294963200 }
  0x12   :  { %365 = dma.done.wait [#allocation9], 2048  }
  0x13   :  { %366 = vsyncadd [#allocation9], 4294965248  ;;  %v104_v0 = vld [vmem:[#allocation5 + $0x78] sm:$0xff]  ;;  %v103_v1 = vld [vmem:[#allocation5 + $0x70] sm:$0xff]  ;;  %s375_s24 = smov [#allocation10]   ;;  %s219_s28 = sshll.u32 %s447_s7, 4  ;;  %s220_s28 = int_to_ptr.hbm [resolvable:$true] %s219_s28 }
  0x14   :  { %109 = vmatpush.msra.mxu0 %v104_v0  ;;  %v102_v2 = vld [vmem:[#allocation5 + $0x68] sm:$0xff]  ;;  %v101_v3 = vld [vmem:[#allocation5 + $0x60] sm:$0xff]  ;;  %v145_v4 = vld [vmem:[#allocation7 + $0x78] sm:$0xff]  ;;  %s217_s25 = sshll.u32 %s375_s24, 4  ;;  %s218_s25 = int_to_ptr.vmem [resolvable:$true] %s217_s25 }
  0x15   :  { %v100_v5 = vld [vmem:[#allocation5 + $0x58] sm:$0xff]  ;;  %150 = vmatpush.msra.mxu1 %v145_v4  ;;  %v144_v6 = vld [vmem:[#allocation7 + $0x70] sm:$0xff]  ;;  %v143_v7 = vld [vmem:[#allocation7 + $0x68] sm:$0xff] }
  0x16   :  { %110 = vmatpush.msra.mxu0 %v103_v1  ;;  %v99_v8 = vld [vmem:[#allocation5 + $0x50] sm:$0xff]  ;;  %v142_v9 = vld [vmem:[#allocation7 + $0x60] sm:$0xff]  ;;  %v98_v10 = vld [vmem:[#allocation5 + $0x48] sm:$0xff] }
  0x17   :  { %151 = vmatpush.msra.mxu1 %v144_v6  ;;  %v141_v11 = vld [vmem:[#allocation7 + $0x58] sm:$0xff]  ;;  %v97_v12 = vld [vmem:[#allocation5 + $0x40] sm:$0xff]  ;;  %v140_v13 = vld [vmem:[#allocation7 + $0x50] sm:$0xff] }
  0x18   :  { %111 = vmatpush.msra.mxu0 %v102_v2  ;;  %v96_v14 = vld [vmem:[#allocation5 + $0x38] sm:$0xff]  ;;  %v139_v15 = vld [vmem:[#allocation7 + $0x48] sm:$0xff]  ;;  %v95_v16 = vld [vmem:[#allocation5 + $0x30] sm:$0xff] }
  0x19   :  { %152 = vmatpush.msra.mxu1 %v143_v7  ;;  %v138_v17 = vld [vmem:[#allocation7 + $0x40] sm:$0xff]  ;;  %v94_v18 = vld [vmem:[#allocation5 + $0x28] sm:$0xff]  ;;  %v137_v19 = vld [vmem:[#allocation7 + $0x38] sm:$0xff] }
  0x1a   :  { %112 = vmatpush.msra.mxu0 %v101_v3  ;;  %v93_v20 = vld [vmem:[#allocation5 + $0x20] sm:$0xff]  ;;  %v136_v21 = vld [vmem:[#allocation7 + $0x30] sm:$0xff]  ;;  %v92_v22 = vld [vmem:[#allocation5 + $0x18] sm:$0xff] }
  0x1b   :  { %153 = vmatpush.msra.mxu1 %v142_v9  ;;  %v135_v23 = vld [vmem:[#allocation7 + $0x28] sm:$0xff]  ;;  %v91_v24 = vld [vmem:[#allocation5 + $0x10] sm:$0xff]  ;;  %v134_v25 = vld [vmem:[#allocation7 + $0x20] sm:$0xff] }
  0x1c   :  { %113 = vmatpush.msra.mxu0 %v100_v5  ;;  %v90_v26 = vld [vmem:[#allocation5 + $0x8] sm:$0xff]  ;;  %v133_v27 = vld [vmem:[#allocation7 + $0x18] sm:$0xff]  ;;  %v89_v28 = vld [vmem:[#allocation5] sm:$0xff] }
  0x1d   :  { %154 = vmatpush.msra.mxu1 %v141_v11  ;;  %v88_v29 = vld [vmem:[#allocation2] sm:$0xff]  ;;  %v132_v30 = vld [vmem:[#allocation7 + $0x10] sm:$0xff]  ;;  %v131_v31 = vld [vmem:[#allocation7 + $0x8] sm:$0xff] }
  0x1e   :  { %114 = vmatpush.msra.mxu0 %v99_v8  ;;  %v130_v32 = vld [vmem:[#allocation7] sm:$0xff]  ;;  %v186_v33 = vld [vmem:[#allocation8 + $0x78] sm:$0xff]  ;;  %v185_v34 = vld [vmem:[#allocation8 + $0x70] sm:$0xff] }
  0x1f   :  { %155 = vmatpush.msra.mxu1 %v140_v13  ;;  %191 = vmatpush.msra.mxu2 %v186_v33  ;;  %v184_v35 = vld [vmem:[#allocation8 + $0x68] sm:$0xff]  ;;  %v183_v36 = vld [vmem:[#allocation8 + $0x60] sm:$0xff]  ;;  %v182_v37 = vld [vmem:[#allocation8 + $0x58] sm:$0xff] }
  0x20   :  { %115 = vmatpush.msra.mxu0 %v98_v10  ;;  %v181_v38 = vld [vmem:[#allocation8 + $0x50] sm:$0xff]  ;;  %v180_v39 = vld [vmem:[#allocation8 + $0x48] sm:$0xff]  ;;  %v179_v40 = vld [vmem:[#allocation8 + $0x40] sm:$0xff] }
  0x21   :  { %156 = vmatpush.msra.mxu1 %v139_v15  ;;  %192 = vmatpush.msra.mxu2 %v185_v34  ;;  %v178_v41 = vld [vmem:[#allocation8 + $0x38] sm:$0xff]  ;;  %v177_v42 = vld [vmem:[#allocation8 + $0x30] sm:$0xff]  ;;  %v176_v43 = vld [vmem:[#allocation8 + $0x28] sm:$0xff] }
  0x22   :  { %116 = vmatpush.msra.mxu0 %v97_v12  ;;  %v175_v44 = vld [vmem:[#allocation8 + $0x20] sm:$0xff]  ;;  %v174_v45 = vld [vmem:[#allocation8 + $0x18] sm:$0xff]  ;;  %v173_v50 = vld [vmem:[#allocation8 + $0x10] sm:$0xff] }
  0x23   :  { %157 = vmatpush.msra.mxu1 %v138_v17  ;;  %193 = vmatpush.msra.mxu2 %v184_v35  ;;  %v238_v46 = vld [vmem:[%s442_s2] ss:$0 sm:$0xff]  ;;  %v172_v51 = vld [vmem:[#allocation8 + $0x8] sm:$0xff]  ;;  %v171_v52 = vld [vmem:[#allocation8] sm:$0xff] }
  0x24   :  { %117 = vmatpush.msra.mxu0 %v96_v14  ;;  %v239_v53 = vld [vmem:[%s444_s4] ss:$0 sm:$0xff] }
  0x25   :  { %158 = vmatpush.msra.mxu1 %v137_v19  ;;  %194 = vmatpush.msra.mxu2 %v183_v36  ;;  %v240_v57 = vld [vmem:[%s446_s6] ss:$0 sm:$0xff] }
  0x26   :  { %118 = vmatpush.msra.mxu0 %v95_v16 }
  0x27   :  { %159 = vmatpush.msra.mxu1 %v136_v21  ;;  %195 = vmatpush.msra.mxu2 %v182_v37 }
  0x28   :  { %119 = vmatpush.msra.mxu0 %v94_v18 }
  0x29   :  { %160 = vmatpush.msra.mxu1 %v135_v23  ;;  %196 = vmatpush.msra.mxu2 %v181_v38 }
  0x2a   :  { %120 = vmatpush.msra.mxu0 %v93_v20 }
  0x2b   :  { %161 = vmatpush.msra.mxu1 %v134_v25  ;;  %197 = vmatpush.msra.mxu2 %v180_v39 }
  0x2c   :  { %121 = vmatpush.msra.mxu0 %v92_v22 }
  0x2d   :  { %162 = vmatpush.msra.mxu1 %v133_v27  ;;  %198 = vmatpush.msra.mxu2 %v179_v40 }
  0x2e   :  { %122 = vmatpush.msra.mxu0 %v91_v24 }
  0x2f   :  { %163 = vmatpush.msra.mxu1 %v132_v30  ;;  %199 = vmatpush.msra.mxu2 %v178_v41 }
  0x30   :  { %123 = vmatpush.msra.mxu0 %v90_v26 }
  0x31   :  { %164 = vmatpush.msra.mxu1 %v131_v31  ;;  %200 = vmatpush.msra.mxu2 %v177_v42 }
  0x32   :  { %124 = vmatpush.msra.mxu0 %v89_v28 }
  0x33   :  { %125 = vmatmul.f32.vlgmr.msra.gmra.mxu0 %v88_v29  ;;  %165 = vmatpush.msra.mxu1 %v130_v32 }
  0x34   :  { %201 = vmatpush.msra.mxu2 %v176_v43 }
  0x36   :  { %202 = vmatpush.msra.mxu2 %v175_v44 }
  0x38   :  { %203 = vmatpush.msra.mxu2 %v174_v45 }
  0x3a   :  { %204 = vmatpush.msra.mxu2 %v173_v50 }
  0x3c   :  { %205 = vmatpush.msra.mxu2 %v172_v51 }
  0x3e   :  { %206 = vmatpush.msra.mxu2 %v171_v52 }
  0xb0   :  { %v126_v47 = vpop.f32.mrf.mxu0 }
  0xb1   :  { %v127_v48 = vadd.f32 %v238_v46, %v126_v47 }
  0xb3   :  { %v129_v49 = vmax.f32 %v127_v48, 0.0 }
  0xb5   :  { %166 = vmatmul.f32.vlgmr.msra.gmra.mxu1 %v129_v49 }
 0x132   :  { %v167_v54 = vpop.f32.mrf.mxu1 }
 0x133   :  { %v168_v55 = vadd.f32 %v239_v53, %v167_v54 }
 0x135   :  { %v170_v56 = vmax.f32 %v168_v55, 0.0 }
 0x137   :  { %207 = vmatmul.f32.vlgmr.msra.gmra.mxu2 %v170_v56 }
 0x1ba   :  { %v208_v58 = vpop.f32.mrf.mxu2 }
 0x1bb   :  { %v209_v59 = vadd.f32 %v240_v57, %v208_v58 }
 0x1bd   :  { %211 = vst [vmem:[#allocation10] sm:$0xff] %v209_v59 }
 0x1be   :  { %222 = dma.vmem_to_hbm [thread:$0]  %s218_s25, 128, %s220_s28, [#allocation4]  }
 0x1bf   :  { %367 = dma.done.wait [#allocation4], 128  }
 0x1c0   :  { %368 = vsyncadd [#allocation4], 4294967168 }
 0x1c1   :  { %227 = vsyncpa [#allocation3], 1 }
 0x1c2   :  { %228 = vsyncpa [#allocation6], 1 }
 0x1c3   :  { %229 = vsyncpa [#allocation9], 1 }
 0x1c4   :  { %230 = vsyncpa [#allocation4], 1 }

</bundles_post_ra>
